<compile_context>
chip_gen: v7x
topology: tpu7x:2x2x1
jax: 0.10.0
libtpu: 0.0.40
codegen_flags: <defaults>
</compile_context>

<pallas_src>
import functools

import jax
import jax.numpy as jnp
from jax.experimental import pallas as pl
from jax.experimental.pallas import tpu as pltpu


# ----------------------------------------------------------------------------- kernel
def neumf_kernel(u_idx_ref, i_idx_ref, utab_ref, itab_ref, w_ref, out_ref):
    """One batch-tile of the folded NeuMF forward.

    u_idx_ref : (1, TB)  int32   user indices (batch on lanes)
    i_idx_ref : (1, TB)  int32   item indices
    utab_ref  : (2F, n_users) f32  [user_mf_emb ; user_mlp_emb]^T
    itab_ref  : (2F, n_items) f32  [item_mf_emb ; item_mlp_emb]^T
    w_ref     : (3F+1, 1) f32    packed [wp_mf ; pu ; pi ; c]
    out_ref   : (1, TB)  f32     predictions (batch on lanes)
    """
    two_f, n_users = utab_ref.shape
    n_items = itab_ref.shape[1]
    F = two_f // 2
    TB = u_idx_ref.shape[1]

    # ---- fused embedding gather: one-hot @ table on the MXU ------------------
    oh_u = jnp.where(
        jax.lax.broadcasted_iota(jnp.int32, (n_users, TB), 0) == u_idx_ref[...],
        1.0, 0.0)                                                   # (n_users, TB)
    oh_i = jnp.where(
        jax.lax.broadcasted_iota(jnp.int32, (n_items, TB), 0) == i_idx_ref[...],
        1.0, 0.0)                                                   # (n_items, TB)
    u_emb = jnp.dot(utab_ref[...], oh_u,
                    preferred_element_type=jnp.float32)             # (2F, TB)
    i_emb = jnp.dot(itab_ref[...], oh_i,
                    preferred_element_type=jnp.float32)             # (2F, TB)

    # ---- packed folded weights ------------------------------------------------
    w = w_ref[...]                     # (3F+1, 1)
    w_mf = w[0:F, :]                   # (F, 1)  prediction weights for GMF branch
    w_pu = w[F:2 * F, :]               # (F, 1)  folded MLP weights, user half
    w_pi = w[2 * F:3 * F, :]           # (F, 1)  folded MLP weights, item half
    c = w[3 * F:3 * F + 1, :]          # (1, 1)  folded biases (incl. predict bias)

    # ---- GMF product + folded MLP, reduced over factors (sublanes) ------------
    contrib = (u_emb[:F, :] * i_emb[:F, :] * w_mf     # GMF branch
               + u_emb[F:, :] * w_pu                  # MLP branch, user embedding
               + i_emb[F:, :] * w_pi)                 # MLP branch, item embedding
    out_ref[...] = jnp.sum(contrib, axis=0, keepdims=True) + c      # (1, TB)


# ----------------------------------------------------------------------------- params
def init_neumf_params(key, n_users, n_items, n_factors, layers):
    """Deterministic parameter init (shapes follow the PyTorch __init__).

    Linear weights stored as [in_features, out_features]; biases as [1, out].
    """
    assert layers[0] == 2 * n_factors
    ks = list(jax.random.split(key, 4 + 2 * (len(layers) - 1) + 2))
    ki = iter(ks)

    params = {
        "user_mf_emb": 0.1 * jax.random.uniform(next(ki), (n_users, n_factors), jnp.float32),
        "item_mf_emb": 0.1 * jax.random.uniform(next(ki), (n_items, n_factors), jnp.float32),
        "user_mlp_emb": 0.1 * jax.random.uniform(next(ki), (n_users, n_factors), jnp.float32),
        "item_mlp_emb": 0.1 * jax.random.uniform(next(ki), (n_items, n_factors), jnp.float32),
        "mlp": [],
    }
    for fan_in, fan_out in zip(layers[:-1], layers[1:]):
        bound = 1.0 / jnp.sqrt(fan_in)
        w = jax.random.uniform(next(ki), (fan_in, fan_out), jnp.float32, -bound, bound)
        b = jax.random.uniform(next(ki), (1, fan_out), jnp.float32, -bound, bound)
        params["mlp"].append((w, b))
    pin = n_factors + layers[-1]
    bound = 1.0 / jnp.sqrt(pin)
    params["predict_w"] = jax.random.uniform(next(ki), (pin, 1), jnp.float32, -bound, bound)
    params["predict_b"] = jax.random.uniform(next(ki), (1, 1), jnp.float32, -bound, bound)
    return params


# ----------------------------------------------------------------------------- wrapper
@functools.partial(jax.jit, static_argnames=("n_factors",))
def neumf_forward(users_index, items_index, params, *, n_factors):
    F = n_factors
    B = users_index.shape[0]

    # Lane tile for the batch axis (lane-dense output, unmasked 128-wide stores).
    TB = 128 if B <= 128 else 512
    padded_B = -(-B // TB) * TB

    # ---- trace-time algebraic fold of the activation-free MLP + predict head --
    # pred = mf_out @ wp_mf + mlp_out @ wp_mlp + bp
    #      = sum_f u_mf*i_mf*wp_mf + u_mlp @ pu + i_mlp @ pi + c
    wp = params["predict_w"]
    wp_mf, wp_mlp = wp[:F, :], wp[F:, :]
    vec = wp_mlp                       # [layers[-1], 1]
    const = params["predict_b"]        # [1, 1]
    for w, b in reversed(params["mlp"]):
        const = const + b @ vec
        vec = w @ vec                  # -> eventually [2F, 1]
    pu, pi = vec[:F, :], vec[F:, :]
    w_packed = jnp.concatenate([wp_mf, pu, pi, const], axis=0)      # (3F+1, 1)

    # ---- embedding tables, transposed so factors sit on sublanes --------------
    user_tab_T = jnp.concatenate(
        [params["user_mf_emb"], params["user_mlp_emb"]], axis=1).T  # (2F, n_users)
    item_tab_T = jnp.concatenate(
        [params["item_mf_emb"], params["item_mlp_emb"]], axis=1).T  # (2F, n_items)

    # ---- indices, batch on lanes, zero-padded to the tile ---------------------
    u_idx = jnp.pad(users_index.astype(jnp.int32), (0, padded_B - B)).reshape(1, padded_B)
    i_idx = jnp.pad(items_index.astype(jnp.int32), (0, padded_B - B)).reshape(1, padded_B)

    out = pl.pallas_call(
        neumf_kernel,
        out_shape=jax.ShapeDtypeStruct((1, padded_B), jnp.float32),
        grid_spec=pltpu.PrefetchScalarGridSpec(
            num_scalar_prefetch=0,
            grid=(padded_B // TB,),
            in_specs=[
                pl.BlockSpec((1, TB), lambda b: (0, b)),            # user indices
                pl.BlockSpec((1, TB), lambda b: (0, b)),            # item indices
                pl.BlockSpec(user_tab_T.shape, lambda b: (0, 0)),   # VMEM-resident
                pl.BlockSpec(item_tab_T.shape, lambda b: (0, 0)),   # VMEM-resident
                pl.BlockSpec(w_packed.shape, lambda b: (0, 0)),     # VMEM-resident
            ],
            out_specs=pl.BlockSpec((1, TB), lambda b: (0, b)),
        ),
        compiler_params=pltpu.CompilerParams(
            dimension_semantics=("parallel",),
        ),
    )(u_idx, i_idx, user_tab_T, item_tab_T, w_packed)

    return out[0, :B]                                               # .view(-1)


# ----------------------------------------------------------------------------- reference
def neumf_reference(users_index, items_index, params, n_factors):
    """Pure-JAX reference mirroring the PyTorch forward (un-folded)."""
    u_mf = params["user_mf_emb"][users_index]
    i_mf = params["item_mf_emb"][items_index]
    u_mlp = params["user_mlp_emb"][users_index]
    i_mlp = params["item_mlp_emb"][items_index]
    mf_out = u_mf * i_mf
    x = jnp.concatenate([u_mlp, i_mlp], axis=-1)
    for w, b in params["mlp"]:
        x = x @ w + b            # no activation (matches the module exactly)
    out = jnp.concatenate([mf_out, x], axis=-1)
    pred = out @ params["predict_w"] + params["predict_b"]
    return pred.reshape(-1)


if __name__ == "__main__":
    # config = {'n_users': 32, 'n_items': 48, 'n_factors': 8, 'layers': [16, 32, 16, 8]}
    n_users, n_items = 32, 48
    n_factors = 8
    layers = [2 * n_factors, 32, 16, 8]
    batch = 8

    key = jax.random.PRNGKey(0)
    k_params, k_u, k_i = jax.random.split(key, 3)
    params = init_neumf_params(k_params, n_users, n_items, n_factors, layers)

    users_index = jax.random.randint(k_u, (batch,), 0, n_users, dtype=jnp.int32)
    items_index = jax.random.randint(k_i, (batch,), 0, n_items, dtype=jnp.int32)

    pred = neumf_forward(users_index, items_index, params, n_factors=n_factors)
    pred = jax.block_until_ready(pred)

    ref = neumf_reference(users_index, items_index, params, n_factors)
    assert pred.shape == (batch,)
    assert jnp.allclose(pred, ref, atol=2e-5, rtol=1e-4), (pred, ref)

    print("KERNEL_OK")
</pallas_src>

<mosaic_0001>
module attributes {stable_mosaic.version = 11 : i64} {
  func.func @neumf_kernel(%arg0: i32, %arg1: memref<1x128xi32, #tpu.memory_space<vmem>>, %arg2: memref<1x128xi32, #tpu.memory_space<vmem>>, %arg3: memref<16x32xf32, #tpu.memory_space<vmem>>, %arg4: memref<16x48xf32, #tpu.memory_space<vmem>>, %arg5: memref<25x1xf32, #tpu.memory_space<vmem>>, %arg6: memref<1x128xf32, #tpu.memory_space<vmem>>) attributes {dimension_semantics = [#tpu.dimension_semantics<parallel>], iteration_bounds = array<i64: 1>, scalar_prefetch = 0 : i64, scratch_operands = 0 : i64, tpu.core_type = #tpu.core_type<tc>, window_params = [{transform_indices = @transform_0, window_bounds = array<i64: 1, 128>}, {transform_indices = @transform_1, window_bounds = array<i64: 1, 128>}, {pipeline_mode = #tpu.pipeline_mode<synchronous>, transform_indices = @transform_2, window_bounds = array<i64: 16, 32>}, {pipeline_mode = #tpu.pipeline_mode<synchronous>, transform_indices = @transform_3, window_bounds = array<i64: 16, 48>}, {pipeline_mode = #tpu.pipeline_mode<synchronous>, transform_indices = @transform_4, window_bounds = array<i64: 25, 1>}, {transform_indices = @transform_5, window_bounds = array<i64: 1, 128>}]} {
    %0 = tpu.iota {dimensions = array<i32: 0>} : vector<32x128xi32>
    %c0 = arith.constant 0 : index
    %c0_0 = arith.constant 0 : index
    %1 = vector.load %arg1[%c0, %c0_0] : memref<1x128xi32, #tpu.memory_space<vmem>>, vector<1x128xi32>
    %2 = vector.broadcast %1 : vector<1x128xi32> to vector<32x128xi32>
    %3 = arith.cmpi eq, %0, %2 : vector<32x128xi32>
    %cst = arith.constant 1.000000e+00 : f32
    %cst_1 = arith.constant 0.000000e+00 : f32
    %4 = vector.broadcast %cst : f32 to vector<32x128xf32>
    %5 = vector.broadcast %cst_1 : f32 to vector<32x128xf32>
    %6 = arith.select %3, %4, %5 : vector<32x128xi1>, vector<32x128xf32>
    %7 = tpu.iota {dimensions = array<i32: 0>} : vector<48x128xi32>
    %c0_2 = arith.constant 0 : index
    %c0_3 = arith.constant 0 : index
    %8 = vector.load %arg2[%c0_2, %c0_3] : memref<1x128xi32, #tpu.memory_space<vmem>>, vector<1x128xi32>
    %9 = vector.broadcast %8 : vector<1x128xi32> to vector<48x128xi32>
    %10 = arith.cmpi eq, %7, %9 : vector<48x128xi32>
    %cst_4 = arith.constant 1.000000e+00 : f32
    %cst_5 = arith.constant 0.000000e+00 : f32
    %11 = vector.broadcast %cst_4 : f32 to vector<48x128xf32>
    %12 = vector.broadcast %cst_5 : f32 to vector<48x128xf32>
    %13 = arith.select %10, %11, %12 : vector<48x128xi1>, vector<48x128xf32>
    %c0_6 = arith.constant 0 : index
    %c0_7 = arith.constant 0 : index
    %14 = vector.load %arg3[%c0_6, %c0_7] : memref<16x32xf32, #tpu.memory_space<vmem>>, vector<16x32xf32>
    %cst_8 = arith.constant dense<0.000000e+00> : vector<16x128xf32>
    %15 = tpu.matmul %14, %6, %cst_8 {dimension_numbers = #tpu.dot_dimension_numbers<[1], [0], [0], [1], [0, 0, 1, 1], [], []>} : vector<16x32xf32>, vector<32x128xf32>, vector<16x128xf32> -> vector<16x128xf32>
    %c0_9 = arith.constant 0 : index
    %c0_10 = arith.constant 0 : index
    %16 = vector.load %arg4[%c0_9, %c0_10] : memref<16x48xf32, #tpu.memory_space<vmem>>, vector<16x48xf32>
    %cst_11 = arith.constant dense<0.000000e+00> : vector<16x128xf32>
    %17 = tpu.matmul %16, %13, %cst_11 {dimension_numbers = #tpu.dot_dimension_numbers<[1], [0], [0], [1], [0, 0, 1, 1], [], []>} : vector<16x48xf32>, vector<48x128xf32>, vector<16x128xf32> -> vector<16x128xf32>
    %c0_12 = arith.constant 0 : index
    %c0_13 = arith.constant 0 : index
    %18 = vector.load %arg5[%c0_12, %c0_13] : memref<25x1xf32, #tpu.memory_space<vmem>>, vector<25x1xf32>
    %19 = vector.extract_strided_slice %18 {offsets = [0, 0], sizes = [8, 1], strides = [1, 1]} : vector<25x1xf32> to vector<8x1xf32>
    %20 = vector.extract_strided_slice %18 {offsets = [8, 0], sizes = [8, 1], strides = [1, 1]} : vector<25x1xf32> to vector<8x1xf32>
    %21 = vector.extract_strided_slice %18 {offsets = [16, 0], sizes = [8, 1], strides = [1, 1]} : vector<25x1xf32> to vector<8x1xf32>
    %22 = vector.extract_strided_slice %18 {offsets = [24, 0], sizes = [1, 1], strides = [1, 1]} : vector<25x1xf32> to vector<1x1xf32>
    %23 = vector.extract_strided_slice %15 {offsets = [0, 0], sizes = [8, 128], strides = [1, 1]} : vector<16x128xf32> to vector<8x128xf32>
    %24 = vector.extract_strided_slice %17 {offsets = [0, 0], sizes = [8, 128], strides = [1, 1]} : vector<16x128xf32> to vector<8x128xf32>
    %25 = arith.mulf %23, %24 : vector<8x128xf32>
    %26 = vector.broadcast %19 : vector<8x1xf32> to vector<8x128xf32>
    %27 = arith.mulf %25, %26 : vector<8x128xf32>
    %28 = vector.extract_strided_slice %15 {offsets = [8, 0], sizes = [8, 128], strides = [1, 1]} : vector<16x128xf32> to vector<8x128xf32>
    %29 = vector.broadcast %20 : vector<8x1xf32> to vector<8x128xf32>
    %30 = arith.mulf %28, %29 : vector<8x128xf32>
    %31 = arith.addf %27, %30 : vector<8x128xf32>
    %32 = vector.extract_strided_slice %17 {offsets = [8, 0], sizes = [8, 128], strides = [1, 1]} : vector<16x128xf32> to vector<8x128xf32>
    %33 = vector.broadcast %21 : vector<8x1xf32> to vector<8x128xf32>
    %34 = arith.mulf %32, %33 : vector<8x128xf32>
    %35 = arith.addf %31, %34 : vector<8x128xf32>
    %cst_14 = arith.constant dense<0.000000e+00> : vector<128xf32>
    %36 = vector.multi_reduction <add>, %35, %cst_14 [0] : vector<8x128xf32> to vector<128xf32>
    %37 = vector.shape_cast %36 : vector<128xf32> to vector<1x128xf32>
    %38 = vector.broadcast %22 : vector<1x1xf32> to vector<1x128xf32>
    %39 = arith.addf %37, %38 : vector<1x128xf32>
    %c0_15 = arith.constant 0 : index
    %c0_16 = arith.constant 0 : index
    %40 = vector.load %arg6[%c0_15, %c0_16] : memref<1x128xf32, #tpu.memory_space<vmem>>, vector<1x128xf32>
    tpu.vector_store %arg6[%c0_15, %c0_16], %39 {strides = array<i32>} : memref<1x128xf32, #tpu.memory_space<vmem>>, vector<1x128xf32>,
    return
  }
  func.func @transform_0(%arg0: i32) -> (i32, i32) {
    %c0_i32 = arith.constant 0 : i32
    %c0_i32_0 = arith.constant 0 : i32
    return %c0_i32, %arg0 : i32, i32
  }
  func.func @transform_1(%arg0: i32) -> (i32, i32) {
    %c0_i32 = arith.constant 0 : i32
    %c0_i32_0 = arith.constant 0 : i32
    return %c0_i32, %arg0 : i32, i32
  }
  func.func @transform_2(%arg0: i32) -> (i32, i32) {
    %c0_i32 = arith.constant 0 : i32
    %c0_i32_0 = arith.constant 0 : i32
    %c0_i32_1 = arith.constant 0 : i32
    return %c0_i32, %c0_i32_0 : i32, i32
  }
  func.func @transform_3(%arg0: i32) -> (i32, i32) {
    %c0_i32 = arith.constant 0 : i32
    %c0_i32_0 = arith.constant 0 : i32
    %c0_i32_1 = arith.constant 0 : i32
    return %c0_i32, %c0_i32_0 : i32, i32
  }
  func.func @transform_4(%arg0: i32) -> (i32, i32) {
    %c0_i32 = arith.constant 0 : i32
    %c0_i32_0 = arith.constant 0 : i32
    %c0_i32_1 = arith.constant 0 : i32
    return %c0_i32, %c0_i32_0 : i32, i32
  }
  func.func @transform_5(%arg0: i32) -> (i32, i32) {
    %c0_i32 = arith.constant 0 : i32
    %c0_i32_0 = arith.constant 0 : i32
    return %c0_i32, %arg0 : i32, i32
  }
}

</mosaic_0001>

<bundles_post_ra>
// kernel: neumf_forward.1
= control target key start
LH: loop header
LB: loop body
LE: loop exit
PB: predicated region body
PF: predicated region fallthrough
CT: control target
= control target key end

     0   :  { %v20_v0 = vlaneseq  ;;  %vm59_vm0 = vcmask 261120   ;;  %vm143_vm1 = vcmask 392192   ;;  %v347_v6 = vmov 0   ;;  %s416_s1 = inlined_call_operand.vmem [shape: s32[1,128], index: 1, kind: input, shape index: {}]   ;;  %s417_s0 = inlined_call_operand.vmem [shape: s32[1,128], index: 0, kind: input, shape index: {}]   ;;  %s418_s2 = inlined_call_operand.vmem [shape: f32[16,32], index: 2, kind: input, shape index: {}]   ;;  %s419_s3 = inlined_call_operand.vmem [shape: f32[16,48], index: 3, kind: input, shape index: {}]   ;;  %s420_s4 = inlined_call_operand.vmem [shape: f32[25,1], index: 4, kind: input, shape index: {}]   ;;  %s421_s5 = inlined_call_operand.vmem [shape: f32[1,128], index: 5, kind: output, shape index: {}]  }
   0x1   :  { %v268_v1 = vld [vmem:[%s416_s1] ss:$0 sm:$0xff]  ;;  %345 = vset.pattern.permute.xlu0 %v347_v6  ;;  %346 = vset.pattern.permute.xlu1 %v347_v6  ;;  %v227_v8 = vld [vmem:[%s420_s4 + $0x10] sm:$0xff]  ;;  %v226_v14 = vld [vmem:[%s420_s4 + $0x8] sm:$0xff]  ;;  %v348_v15 = vmov 1.0|1.0  }
   0x2   :  { %v57_v2 = vld [vmem:[%s418_s2] sm:$0xff]  ;;  %v21_v3 = vshrl.u32 %v20_v0, 7  ;;  %245 = vperm.xlu1 %346, %v227_v8   ;;  %v228_v16 = vld [vmem:[%s420_s4 + $0x18] sm:$0x1]  ;;  %v58_v17 = vld [vmem:[%s418_s2 + $0x8] sm:$0xff] }
   0x3   :  { %v267_v4 = vld [vmem:[%s417_s0] ss:$0 sm:$0xff]  ;;  %305 = vmatprep.mubr.msk.f32.mxu0 %vm59_vm0, %v57_v2  ;;  %v142_v18 = vld [vmem:[%s419_s3 + $0x8] sm:$0xff] }
   0x4   :  { %v141_v5 = vld [vmem:[%s419_s3] sm:$0xff]  ;;  %v22_v9 = vadd.s32 8, %v21_v3  ;;  %vm45_vm2 = vcmp.eq.s32.totalorder %v21_v3, %v268_v1  ;;  %v23_v10 = vadd.s32 16, %v21_v3  ;;  %vm30_vm3 = vcmp.eq.s32.totalorder %v21_v3, %v267_v4 }
   0x5   :  { %320 = vmatprep.mubr.msk.f32.mxu1 %vm143_vm1, %v141_v5  ;;  %v225_v7 = vld [vmem:[%s420_s4] sm:$0xff]  ;;  %v24_v11 = vadd.s32 24, %v21_v3  ;;  %v38_v12 = vadd.s32 32, %v21_v3  ;;  %v39_v13 = vadd.s32 40, %v21_v3 }
   0x6   :  { %232 = vperm.xlu0 %345, %v225_v7   ;;  %vm46_vm4 = vcmp.eq.s32.totalorder %v22_v9, %v268_v1  ;;  %vm31_vm5 = vcmp.eq.s32.totalorder %v22_v9, %v267_v4  ;;  %vm47_vm6 = vcmp.eq.s32.totalorder %v23_v10, %v268_v1  ;;  %vm32_vm9 = vcmp.eq.s32.totalorder %v23_v10, %v267_v4 }
   0x7   :  { %vm331_vm7 = vmpackc.low %vm46_vm4, %vm45_vm2  ;;  %vm48_vm8 = vcmp.eq.s32.totalorder %v24_v11, %v268_v1  ;;  %vm33_vm10 = vcmp.eq.s32.totalorder %v24_v11, %v267_v4  ;;  %vm49_vm12 = vcmp.eq.s32.totalorder %v38_v12, %v268_v1  ;;  %vm50_vm13 = vcmp.eq.s32.totalorder %v39_v13, %v268_v1  ;;  %258 = vperm.xlu1 %346, %v228_v16  }
   0x8   :  { %332 = vmatprep.subr.msk.bf16.mxu1 %vm331_vm7, %v348_v15  ;;  %vm323_vm11 = vmpackc.low %vm31_vm5, %vm30_vm3 }
   0x9   :  { %334 = vmatpush3.bf16.msk.msra.mxu1 %vm331_vm7, %v348_v15  ;;  %324 = vmatprep.subr.msk.bf16.mxu0 %vm323_vm11, %v348_v15  ;;  %vm335_vm14 = vmpackc.low %vm48_vm8, %vm47_vm6 }
   0xa   :  { %238 = vperm.xlu0 %345, %v226_v14   ;;  %326 = vmatpush3.bf16.msk.msra.mxu0 %vm323_vm11, %v348_v15  ;;  %vm327_vm15 = vmpackc.low %vm33_vm10, %vm32_vm9 }
   0xb   :  { %336 = vmatprep.subr.msk.bf16.mxu1 %vm335_vm14, %v348_v15  ;;  %328 = vmatprep.subr.msk.bf16.mxu0 %vm327_vm15, %v348_v15  ;;  %vm339_vm2 = vmpackc.low %vm50_vm13, %vm49_vm12 }
   0xd   :  { %338 = vmatpush3.bf16.msk.msra.mxu1 %vm335_vm14, %v348_v15 }
   0xe   :  { %330 = vmatpush3.bf16.msk.msra.mxu0 %vm327_vm15, %v348_v15  ;;  %340 = vmatprep.subr.msk.bf16.mxu1 %vm339_vm2, %v348_v15 }
  0x11   :  { %342 = vmatpush3.bf16.msk.msra.mxu1 %vm339_vm2, %v348_v15  ;;  %306 = vmatmul.mubr.msk.f32.vlgmr.msra.gmra.mrb[0].mxu0 %vm59_vm0, %v58_v17 }
  0x14   :  { %321 = vmatmul.mubr.msk.f32.vlgmr.msra.gmra.mrb[0].mxu1 %vm143_vm1, %v142_v18 }
  0x81   :  { %v246_v26 = vpop.permute.xlu1 %245 }
  0x85   :  { %v233_v19 = vpop.permute.xlu0 %232 }
  0x86   :  { %v259_v38 = vpop.permute.xlu1 %258 }
  0x89   :  { %v239_v23 = vpop.permute.xlu0 %238 }
  0xe4   :  { %v307_v20 = vpop.f32.mrb[0].mxu0 }
  0xe5   :  { %v132_v21 = vpop.f32.mrb[1].mxu0  ;;  %v241_v27 = vmul.f32 %v307_v20, %v239_v23 }
  0xe7   :  { %v322_v22 = vpop.f32.mrb[0].mxu1 }
  0xe8   :  { %v216_v24 = vpop.f32.mrb[1].mxu1  ;;  %v248_v29 = vmul.f32 %v322_v22, %v246_v26 }
  0xe9   :  { %v229_v25 = vmul.f32 %v216_v24, %v132_v21 }
  0xeb   :  { %v235_v28 = vmul.f32 %v233_v19, %v229_v25 }
  0xed   :  { %v242_v30 = vadd.f32 %v241_v27, %v235_v28 }
  0xef   :  { %v249_v31 = vadd.f32 %v248_v29, %v242_v30 }
  0xf1   :  { %v250_v32 = vrot.slane %v249_v31, 4 }
  0xf3   :  { %v251_v33 = vadd.f32 %v250_v32, %v249_v31 }
  0xf5   :  { %v252_v34 = vrot.slane %v251_v33, 2 }
  0xf7   :  { %v253_v35 = vadd.f32 %v252_v34, %v251_v33 }
  0xf9   :  { %v254_v36 = vrot.slane %v253_v35, 1 }
  0xfb   :  { %v255_v37 = vadd.f32 %v254_v36, %v253_v35 }
  0xfd   :  { %v261_v39 = vadd.f32 %v259_v38, %v255_v37 }
  0xff   :  { %262 = vst [vmem:[%s421_s5] sm:$0x1] %v261_v39 }

</bundles_post_ra>
